<compile_context>
chip_gen: v7x
topology: tpu7x:2x2x1
jax: 0.10.0
libtpu: 0.0.40
codegen_flags: <defaults>
</compile_context>

<pallas_src>
import functools

import numpy as np
import jax
import jax.numpy as jnp
from jax.experimental import pallas as pl
from jax.experimental.pallas import tpu as pltpu


def _round_up(x, m):
    return (x + m - 1) // m * m


def _sigmoid(x):
    # sigmoid(x) == 0.5*(tanh(x/2)+1): tanh goes to the EUP slot, no VPU
    # divide / Newton-reciprocal sequence (perf-review item).
    return 0.5 * (jnp.tanh(0.5 * x) + 1.0)


# ---------------------------------------------------------------------------
# Fused CLSTM-cell kernel (one grid step per batch element)
# ---------------------------------------------------------------------------

def _clstm_kernel(x_ref, w_ref, c_ref, h_out_ref, c_out_ref, *, Ch):
    # x_ref : (1, Kp, HW)  bf16  full im2col patches (rows k=(kh*KW+kw)*Cs+ci),
    #                            row K is constant 1.0 (bias lane), rest zero.
    # w_ref : (4*Ch, Kp)   bf16  reordered conv weights, bias folded in col K.
    # c_ref : (1, Ch, HW)  f32   previous cell state, channel-major (NCHW-flat).
    # outs  : (1, Ch, HW)  f32   hidden, cell (channel-major, lane-dense).

    # One full-K MXU matmul; gates come out natively channel-major so the
    # epilogue needs no transpose.  Bias enters via the folded 1.0 x-row.
    gates = jnp.dot(w_ref[...], x_ref[0],
                    preferred_element_type=jnp.float32)       # (4*Ch, HW) f32

    i_g = _sigmoid(gates[0 * Ch:1 * Ch])                      # in gate
    f_g = _sigmoid(gates[1 * Ch:2 * Ch])                      # remember (forget)
    o_g = _sigmoid(gates[2 * Ch:3 * Ch])                      # out gate
    g_g = jnp.tanh(gates[3 * Ch:4 * Ch])                      # cell gate

    cell = f_g * c_ref[0] + i_g * g_g                         # f32 (Ch, HW)
    h_out_ref[0] = o_g * jnp.tanh(cell)
    c_out_ref[0] = cell


# ---------------------------------------------------------------------------
# One-time weight packing (hoisted out of the per-step path)
# ---------------------------------------------------------------------------

def pack_clstm_weights(w, b):
    """PyTorch Conv2d weights (4*Ch, Cs, KH, KW) + bias (4*Ch,) ->
    (4*Ch, Kp) bf16.  Column k = (kh*KW + kw)*Cs + ci holds w[:, ci, kh, kw];
    column K holds the bias (matched by a constant-1 row in the x patches);
    columns > K are zero.  Do this ONCE per parameter set (loop-invariant)."""
    Co, Cs, KH, KW = w.shape
    K = KH * KW * Cs
    Kp = _round_up(K + 1, 128)                                 # lane-align contraction
    wt = jnp.transpose(w.astype(jnp.float32), (0, 2, 3, 1)).reshape(Co, K)
    wt = jnp.concatenate(
        [wt,
         b.astype(jnp.float32).reshape(Co, 1),                 # bias column
         jnp.zeros((Co, Kp - K - 1), jnp.float32)], axis=1)
    return wt.astype(jnp.bfloat16)                             # (Co, Kp)


# ---------------------------------------------------------------------------
# Per-step wrapper: short prologue + pallas_call
# ---------------------------------------------------------------------------

@functools.partial(jax.jit,
                   static_argnames=("hidden_size", "kernel_size", "padding"))
def _clstm_step(w_packed, input_, prev_hidden, prev_cell,
                *, hidden_size, kernel_size, padding):
    N, Cin, H, W = input_.shape
    Ch = hidden_size
    KH = KW = kernel_size
    p = padding
    Cs = Cin + Ch
    Co = 4 * Ch
    HW = H * W
    K = KH * KW * Cs
    Kp = w_packed.shape[1]

    # ---- prologue: cast to bf16 early, one pad, one concat builds the full
    #      im2col + bias row + contraction padding in a single fusion ----
    stacked = jnp.concatenate([input_, prev_hidden], axis=1).astype(jnp.bfloat16)
    xp = jnp.pad(stacked, ((0, 0), (0, 0), (p, p), (p, p)))    # (N, Cs, Hp, Wp)
    pieces = [xp[:, :, kh:kh + H, kw:kw + W]                   # (N, Cs, H, W)/tap
              for kh in range(KH) for kw in range(KW)]
    pieces.append(jnp.ones((N, 1, H, W), jnp.bfloat16))        # bias lane (=1.0)
    if Kp - K - 1 > 0:
        pieces.append(jnp.zeros((N, Kp - K - 1, H, W), jnp.bfloat16))
    xcol = jnp.concatenate(pieces, axis=1).reshape(N, Kp, HW)  # (N, Kp, HW)

    # previous cell state: NCHW -> (N, Ch, HW) is a free (channel-major) reshape
    cprev = prev_cell.astype(jnp.float32).reshape(N, Ch, HW)

    # NOTE: lane density assumes HW % 128 == 0; other sizes stay correct but
    # degrade to masked partial stores.
    kernel = functools.partial(_clstm_kernel, Ch=Ch)
    hidden, cell = pl.pallas_call(
        kernel,
        grid=(N,),
        in_specs=[
            pl.BlockSpec((1, Kp, HW), lambda b: (b, 0, 0)),    # patches   (bf16)
            pl.BlockSpec((Co, Kp), lambda b: (0, 0)),          # weights   (bf16)
            pl.BlockSpec((1, Ch, HW), lambda b: (b, 0, 0)),    # prev cell (f32)
        ],
        out_specs=(
            pl.BlockSpec((1, Ch, HW), lambda b: (b, 0, 0)),
            pl.BlockSpec((1, Ch, HW), lambda b: (b, 0, 0)),
        ),
        out_shape=(
            jax.ShapeDtypeStruct((N, Ch, HW), jnp.float32),    # hidden
            jax.ShapeDtypeStruct((N, Ch, HW), jnp.float32),    # cell
        ),
        compiler_params=pltpu.CompilerParams(
            dimension_semantics=("parallel",)),
    )(xcol, w_packed, cprev)

    return hidden.reshape(N, Ch, H, W), cell.reshape(N, Ch, H, W)


def clstm_cell_forward(w_packed, input_, prev_state,
                       *, hidden_size, kernel_size, padding):
    """Mirrors CLSTMCell.forward: prev_state may be None (zero-initialized)."""
    N, _, H, W = input_.shape
    if prev_state is None:
        z = jnp.zeros((N, hidden_size, H, W), jnp.float32)
        prev_state = (z, z)
    prev_hidden, prev_cell = prev_state
    return _clstm_step(w_packed, input_, prev_hidden, prev_cell,
                       hidden_size=hidden_size, kernel_size=kernel_size,
                       padding=padding)


# ---------------------------------------------------------------------------
# Pure-JAX reference (same precision regime: bf16 conv operands, f32 accum,
# bias rounded through bf16 because the kernel folds it into bf16 weights)
# ---------------------------------------------------------------------------

def reference_forward(params, input_, prev_state,
                      *, hidden_size, kernel_size, padding):
    N, _, H, W = input_.shape
    if prev_state is None:
        z = jnp.zeros((N, hidden_size, H, W), jnp.float32)
        prev_state = (z, z)
    prev_hidden, prev_cell = prev_state
    stacked = jnp.concatenate([input_, prev_hidden], axis=1)
    gates = jax.lax.conv_general_dilated(
        stacked.astype(jnp.bfloat16), params["w"].astype(jnp.bfloat16),
        window_strides=(1, 1), padding=[(padding, padding)] * 2,
        dimension_numbers=("NCHW", "OIHW", "NCHW"),
        preferred_element_type=jnp.float32)
    bias = params["b"].astype(jnp.bfloat16).astype(jnp.float32)
    gates = gates + bias[None, :, None, None]
    i_g, f_g, o_g, g_g = jnp.split(gates, 4, axis=1)
    i_g, f_g, o_g = jax.nn.sigmoid(i_g), jax.nn.sigmoid(f_g), jax.nn.sigmoid(o_g)
    g_g = jnp.tanh(g_g)
    cell = f_g * prev_cell.astype(jnp.float32) + i_g * g_g
    hidden = o_g * jnp.tanh(cell)
    return hidden, cell


# ---------------------------------------------------------------------------

if __name__ == "__main__":
    # small config: batch=2, input channels=4, spatial=16x16, hidden=32, 3x3 conv
    N, Cin, H, W = 2, 4, 16, 16
    hidden_size, ksize, pad = 32, 3, 1

    key = jax.random.PRNGKey(0)
    kw_, kb_, kx_, kh_, kc_ = jax.random.split(key, 5)
    params = {
        "w": 0.1 * jax.random.normal(
            kw_, (4 * hidden_size, Cin + hidden_size, ksize, ksize), jnp.float32),
        "b": 0.1 * jax.random.normal(kb_, (4 * hidden_size,), jnp.float32),
    }
    x = jax.random.normal(kx_, (N, Cin, H, W), jnp.float32)
    h0 = jax.random.normal(kh_, (N, hidden_size, H, W), jnp.float32)
    c0 = jax.random.normal(kc_, (N, hidden_size, H, W), jnp.float32)

    # weight prep done ONCE (loop-invariant for recurrent use)
    w_packed = jax.block_until_ready(pack_clstm_weights(params["w"], params["b"]))

    # --- with an explicit previous state
    hid, cell = clstm_cell_forward(w_packed, x, (h0, c0),
                                   hidden_size=hidden_size,
                                   kernel_size=ksize, padding=pad)
    hid, cell = jax.block_until_ready((hid, cell))
    ref_h, ref_c = reference_forward(params, x, (h0, c0),
                                     hidden_size=hidden_size,
                                     kernel_size=ksize, padding=pad)
    np.testing.assert_allclose(np.asarray(hid), np.asarray(ref_h),
                               rtol=2e-3, atol=2e-3)
    np.testing.assert_allclose(np.asarray(cell), np.asarray(ref_c),
                               rtol=2e-3, atol=2e-3)

    # --- prev_state=None path (module creates zero states)
    hid0, cell0 = clstm_cell_forward(w_packed, x, None,
                                     hidden_size=hidden_size,
                                     kernel_size=ksize, padding=pad)
    hid0, cell0 = jax.block_until_ready((hid0, cell0))
    ref_h0, ref_c0 = reference_forward(params, x, None,
                                       hidden_size=hidden_size,
                                       kernel_size=ksize, padding=pad)
    np.testing.assert_allclose(np.asarray(hid0), np.asarray(ref_h0),
                               rtol=2e-3, atol=2e-3)
    np.testing.assert_allclose(np.asarray(cell0), np.asarray(ref_c0),
                               rtol=2e-3, atol=2e-3)

    assert hid.shape == (N, hidden_size, H, W) and cell.shape == hid.shape
    print("KERNEL_OK")
</pallas_src>

<mosaic_0001>
module attributes {stable_mosaic.version = 11 : i64} {
  func.func @_clstm_kernel(%arg0: i32, %arg1: memref<1x384x256xbf16, #tpu.memory_space<vmem>>, %arg2: memref<128x384xbf16, #tpu.memory_space<vmem>>, %arg3: memref<1x32x256xf32, #tpu.memory_space<vmem>>, %arg4: memref<1x32x256xf32, #tpu.memory_space<vmem>>, %arg5: memref<1x32x256xf32, #tpu.memory_space<vmem>>) attributes {dimension_semantics = [#tpu.dimension_semantics<parallel>], iteration_bounds = array<i64: 2>, scalar_prefetch = 0 : i64, scratch_operands = 0 : i64, tpu.core_type = #tpu.core_type<tc>, window_params = [{transform_indices = @transform_0, window_bounds = array<i64: 1, 384, 256>}, {pipeline_mode = #tpu.pipeline_mode<synchronous>, transform_indices = @transform_1, window_bounds = array<i64: 128, 384>}, {transform_indices = @transform_2, window_bounds = array<i64: 1, 32, 256>}, {transform_indices = @transform_3, window_bounds = array<i64: 1, 32, 256>}, {transform_indices = @transform_4, window_bounds = array<i64: 1, 32, 256>}]} {
    %c0 = arith.constant 0 : index
    %c0_0 = arith.constant 0 : index
    %0 = vector.load %arg2[%c0, %c0_0] : memref<128x384xbf16, #tpu.memory_space<vmem>>, vector<128x384xbf16>
    %c0_1 = arith.constant 0 : index
    %c0_2 = arith.constant 0 : index
    %c0_3 = arith.constant 0 : index
    %1 = vector.load %arg1[%c0_1, %c0_2, %c0_3] : memref<1x384x256xbf16, #tpu.memory_space<vmem>>, vector<1x384x256xbf16>
    %2 = vector.shape_cast %1 : vector<1x384x256xbf16> to vector<384x256xbf16>
    %cst = arith.constant dense<0.000000e+00> : vector<128x256xf32>
    %3 = tpu.matmul %0, %2, %cst {dimension_numbers = #tpu.dot_dimension_numbers<[1], [0], [0], [1], [0, 0, 1, 1], [], []>} : vector<128x384xbf16>, vector<384x256xbf16>, vector<128x256xf32> -> vector<128x256xf32>
    %4 = vector.extract_strided_slice %3 {offsets = [0, 0], sizes = [32, 256], strides = [1, 1]} : vector<128x256xf32> to vector<32x256xf32>
    %cst_4 = arith.constant 5.000000e-01 : f32
    %5 = vector.broadcast %cst_4 : f32 to vector<32x256xf32>
    %6 = arith.mulf %5, %4 : vector<32x256xf32>
    %7 = math.tanh %6 : vector<32x256xf32>
    %cst_5 = arith.constant 1.000000e+00 : f32
    %8 = vector.broadcast %cst_5 : f32 to vector<32x256xf32>
    %9 = arith.addf %7, %8 : vector<32x256xf32>
    %cst_6 = arith.constant 5.000000e-01 : f32
    %10 = vector.broadcast %cst_6 : f32 to vector<32x256xf32>
    %11 = arith.mulf %10, %9 : vector<32x256xf32>
    %12 = vector.extract_strided_slice %3 {offsets = [32, 0], sizes = [32, 256], strides = [1, 1]} : vector<128x256xf32> to vector<32x256xf32>
    %cst_7 = arith.constant 5.000000e-01 : f32
    %13 = vector.broadcast %cst_7 : f32 to vector<32x256xf32>
    %14 = arith.mulf %13, %12 : vector<32x256xf32>
    %15 = math.tanh %14 : vector<32x256xf32>
    %cst_8 = arith.constant 1.000000e+00 : f32
    %16 = vector.broadcast %cst_8 : f32 to vector<32x256xf32>
    %17 = arith.addf %15, %16 : vector<32x256xf32>
    %cst_9 = arith.constant 5.000000e-01 : f32
    %18 = vector.broadcast %cst_9 : f32 to vector<32x256xf32>
    %19 = arith.mulf %18, %17 : vector<32x256xf32>
    %20 = vector.extract_strided_slice %3 {offsets = [64, 0], sizes = [32, 256], strides = [1, 1]} : vector<128x256xf32> to vector<32x256xf32>
    %cst_10 = arith.constant 5.000000e-01 : f32
    %21 = vector.broadcast %cst_10 : f32 to vector<32x256xf32>
    %22 = arith.mulf %21, %20 : vector<32x256xf32>
    %23 = math.tanh %22 : vector<32x256xf32>
    %cst_11 = arith.constant 1.000000e+00 : f32
    %24 = vector.broadcast %cst_11 : f32 to vector<32x256xf32>
    %25 = arith.addf %23, %24 : vector<32x256xf32>
    %cst_12 = arith.constant 5.000000e-01 : f32
    %26 = vector.broadcast %cst_12 : f32 to vector<32x256xf32>
    %27 = arith.mulf %26, %25 : vector<32x256xf32>
    %28 = vector.extract_strided_slice %3 {offsets = [96, 0], sizes = [32, 256], strides = [1, 1]} : vector<128x256xf32> to vector<32x256xf32>
    %29 = math.tanh %28 : vector<32x256xf32>
    %c0_13 = arith.constant 0 : index
    %c0_14 = arith.constant 0 : index
    %c0_15 = arith.constant 0 : index
    %30 = vector.load %arg3[%c0_13, %c0_14, %c0_15] : memref<1x32x256xf32, #tpu.memory_space<vmem>>, vector<1x32x256xf32>
    %31 = vector.shape_cast %30 : vector<1x32x256xf32> to vector<32x256xf32>
    %32 = arith.mulf %19, %31 : vector<32x256xf32>
    %33 = arith.mulf %11, %29 : vector<32x256xf32>
    %34 = arith.addf %32, %33 : vector<32x256xf32>
    %35 = math.tanh %34 : vector<32x256xf32>
    %36 = arith.mulf %27, %35 : vector<32x256xf32>
    %c0_16 = arith.constant 0 : index
    %c0_17 = arith.constant 0 : index
    %c0_18 = arith.constant 0 : index
    %37 = vector.load %arg4[%c0_16, %c0_17, %c0_18] : memref<1x32x256xf32, #tpu.memory_space<vmem>>, vector<1x32x256xf32>
    %38 = vector.shape_cast %37 : vector<1x32x256xf32> to vector<32x256xf32>
    %39 = vector.shape_cast %36 : vector<32x256xf32> to vector<1x32x256xf32>
    tpu.vector_store %arg4[%c0_16, %c0_17, %c0_18], %39 {strides = array<i32>} : memref<1x32x256xf32, #tpu.memory_space<vmem>>, vector<1x32x256xf32>,
    %c0_19 = arith.constant 0 : index
    %c0_20 = arith.constant 0 : index
    %c0_21 = arith.constant 0 : index
    %40 = vector.load %arg5[%c0_19, %c0_20, %c0_21] : memref<1x32x256xf32, #tpu.memory_space<vmem>>, vector<1x32x256xf32>
    %41 = vector.shape_cast %40 : vector<1x32x256xf32> to vector<32x256xf32>
    %42 = vector.shape_cast %34 : vector<32x256xf32> to vector<1x32x256xf32>
    tpu.vector_store %arg5[%c0_19, %c0_20, %c0_21], %42 {strides = array<i32>} : memref<1x32x256xf32, #tpu.memory_space<vmem>>, vector<1x32x256xf32>,
    return
  }
  func.func @transform_0(%arg0: i32) -> (i32, i32, i32) {
    %c0_i32 = arith.constant 0 : i32
    %c0_i32_0 = arith.constant 0 : i32
    %c0_i32_1 = arith.constant 0 : i32
    return %arg0, %c0_i32, %c0_i32_0 : i32, i32, i32
  }
  func.func @transform_1(%arg0: i32) -> (i32, i32) {
    %c0_i32 = arith.constant 0 : i32
    %c0_i32_0 = arith.constant 0 : i32
    %c0_i32_1 = arith.constant 0 : i32
    return %c0_i32, %c0_i32_0 : i32, i32
  }
  func.func @transform_2(%arg0: i32) -> (i32, i32, i32) {
    %c0_i32 = arith.constant 0 : i32
    %c0_i32_0 = arith.constant 0 : i32
    %c0_i32_1 = arith.constant 0 : i32
    return %arg0, %c0_i32, %c0_i32_0 : i32, i32, i32
  }
  func.func @transform_3(%arg0: i32) -> (i32, i32, i32) {
    %c0_i32 = arith.constant 0 : i32
    %c0_i32_0 = arith.constant 0 : i32
    %c0_i32_1 = arith.constant 0 : i32
    return %arg0, %c0_i32, %c0_i32_0 : i32, i32, i32
  }
  func.func @transform_4(%arg0: i32) -> (i32, i32, i32) {
    %c0_i32 = arith.constant 0 : i32
    %c0_i32_0 = arith.constant 0 : i32
    %c0_i32_1 = arith.constant 0 : i32
    return %arg0, %c0_i32, %c0_i32_0 : i32, i32, i32
  }
}

</mosaic_0001>

<bundles_post_ra>
// kernel: _clstm_step.1
= control target key start
LH: loop header
LB: loop body
LE: loop exit
PB: predicated region body
PF: predicated region fallthrough
CT: control target
= control target key end

     0   :  { %s1523_s15 = smov 0   ;;  %s1763_s0 = inlined_call_operand.vmem [shape: bf16[2,384,256], index: 0, kind: input, shape index: {}]   ;;  %s1764_s1 = inlined_call_operand.vmem [shape: bf16[128,384], index: 1, kind: input, shape index: {}]   ;;  %s1765_s2 = inlined_call_operand.vmem [shape: f32[2,32,256], index: 2, kind: input, shape index: {}]   ;;  %s1766_s3 = inlined_call_operand.vmem [shape: f32[2,32,256], index: 3, kind: output, shape index: {0}]   ;;  %s1767_s4 = inlined_call_operand.vmem [shape: f32[2,32,256], index: 4, kind: output, shape index: {1}]  }
   0x1 LB: > { %s1174_s16 = sadd.s32 4294967295, %s1495_s15   ;;  %p1178_p0 = scmp.ge.s32.totalorder %s1495_s15, 1  ;;  %s1495_s15 = sphi %s1523_s15, %s15_s15  }
   0x2   : > { %p175_p1 = scmp.lt.s32.totalorder %s1495_s15, 3 }
   0x4   : > { %p176_p2 = pnand %p1178_p0, %p175_p1 }
   0x5   : > { %p211_p3 = scmp.lt.s32.totalorder (!%p176_p2), %s1174_s16, 1  ;;  %v1497_v0 = vmov (!%p176_p2), 0   ;;  %v1380_v1 = vld [vmem:[%s1764_s1 + $0x4] ss:$12 sps:$4 sm:$0xff] (!%p176_p2)   ;;  %v1377_v41 = vld [vmem:[%s1764_s1 + $0x8] ss:$12 sps:$4 sm:$0xff] (!%p176_p2)  }
   0x6   : > { %179 = sbr.rel (%p176_p2) target bundleno = 384 (0x180), region = 32  ;;  %825 = vmatprep.mubr.bf16.mxu0 (!%p176_p2), %v1497_v0  ;;  %712 = vmatprep.mubr.bf16.mxu1 (!%p176_p2), %v1380_v1  ;;  %v1381_v46 = vld [vmem:[%s1764_s1 + $0x20] ss:$12 sps:$4 sm:$0xff] (!%p176_p2)   ;;  %v1385_v51 = vld [vmem:[%s1764_s1 + $0x38] ss:$12 sps:$4 sm:$0xff] (!%p176_p2)  }
   0x7   : > { %v1378_v53 = vld [vmem:[%s1764_s1] ss:$12 sps:$4 sm:$0xff] (!%p176_p2)   ;;  %v1382_v54 = vld [vmem:[%s1764_s1 + $0x1c] ss:$12 sps:$4 sm:$0xff] (!%p176_p2)   ;;  %v1384_v56 = vld [vmem:[%s1764_s1 + $0x18] ss:$12 sps:$4 sm:$0xff] (!%p176_p2)  }
   0x8   : > { %v1389_v55 = vld [vmem:[%s1764_s1 + $0x50] ss:$12 sps:$4 sm:$0xff] (!%p176_p2)   ;;  %v1386_v57 = vld [vmem:[%s1764_s1 + $0x34] ss:$12 sps:$4 sm:$0xff] (!%p176_p2)   ;;  %v1390_v60 = vld [vmem:[%s1764_s1 + $0x4c] ss:$12 sps:$4 sm:$0xff] (!%p176_p2)  }
   0x9   : > { %v1393_v58 = vld [vmem:[%s1764_s1 + $0x68] ss:$12 sps:$4 sm:$0xff] (!%p176_p2)   ;;  %v1388_v59 = vld [vmem:[%s1764_s1 + $0x30] ss:$12 sps:$4 sm:$0xff] (!%p176_p2)   ;;  %v1397_v61 = vld [vmem:[%s1764_s1 + $0x80] ss:$12 sps:$4 sm:$0xff] (!%p176_p2)  }
   0xa   : > { %v1392_v62 = vld [vmem:[%s1764_s1 + $0x48] ss:$12 sps:$4 sm:$0xff] (!%p176_p2)   ;;  %v1394_v63 = vld [vmem:[%s1764_s1 + $0x64] ss:$12 sps:$4 sm:$0xff] (!%p176_p2)  }
   0xb   : > { %v1401_v1 = vld [vmem:[%s1764_s1 + $0x98] ss:$12 sps:$4 sm:$0xff] (!%p176_p2)  }
   0xd   : > { %s1769_s16 = smov (!%p211_p3, %s1174_s16), 1 }
   0xe   : > { %s1295_s19 = smul.u32 384, %s1769_s16  ;;  %s1697_s21 = sshll.u32 %s1769_s16, 6 }
   0xf   : > { %s1710_s23 = scalar_lea.vmem %s1765_s2, %s1697_s21  ;;  %s1729_s26 = scalar_lea.vmem %s1767_s4, %s1697_s21 }
  0x10   : > { %s1541_s22 = scalar_lea.vmem %s1763_s0, %s1295_s19  ;;  %s1748_s29 = scalar_lea.vmem %s1766_s3, %s1697_s21 }
  0x11   : > { %v1305_v2 = vld [vmem:[%s1541_s22 + $0x4] ss:$8 sps:$4 sm:$0xff]   ;;  %v1307_v3 = vld [vmem:[%s1541_s22] ss:$8 sps:$4 sm:$0xff]   ;;  %v1308_v4 = vld [vmem:[%s1541_s22 + $0x14] ss:$8 sps:$4 sm:$0xff]  }
  0x12   : > { %680 = vmatprep.subr.bf16.mxu1 %v1305_v2  ;;  %v1310_v5 = vld [vmem:[%s1541_s22 + $0x10] ss:$8 sps:$4 sm:$0xff]   ;;  %v1311_v6 = vld [vmem:[%s1541_s22 + $0x24] ss:$8 sps:$4 sm:$0xff]   ;;  %v1313_v7 = vld [vmem:[%s1541_s22 + $0x20] ss:$8 sps:$4 sm:$0xff]  }
  0x13   : > { %681 = vmatpush1.bf16.msra.mxu1 %v1307_v3  ;;  %v1314_v8 = vld [vmem:[%s1541_s22 + $0x34] ss:$8 sps:$4 sm:$0xff]   ;;  %v1316_v9 = vld [vmem:[%s1541_s22 + $0x30] ss:$8 sps:$4 sm:$0xff]   ;;  %v1329_v10 = vld [vmem:[%s1541_s22 + $0x104] ss:$8 sps:$4 sm:$0xff]  }
  0x14   : > { %682 = vmatprep.subr.bf16.mxu1 %v1308_v4  ;;  %v1331_v11 = vld [vmem:[%s1541_s22 + $0x100] ss:$8 sps:$4 sm:$0xff]   ;;  %v1317_v12 = vld [vmem:[%s1541_s22 + $0x44] ss:$8 sps:$4 sm:$0xff]   ;;  %793 = vmatprep.subr.bf16.mxu0 %v1329_v10  ;;  %v1335_v13 = vld [vmem:[%s1541_s22 + $0x114] ss:$8 sps:$4 sm:$0xff]  }
  0x15   : > { %794 = vmatpush1.bf16.msra.mxu0 %v1331_v11  ;;  %v1337_v14 = vld [vmem:[%s1541_s22 + $0x110] ss:$8 sps:$4 sm:$0xff]   ;;  %v1319_v15 = vld [vmem:[%s1541_s22 + $0x40] ss:$8 sps:$4 sm:$0xff]   ;;  %v1320_v16 = vld [vmem:[%s1541_s22 + $0x54] ss:$8 sps:$4 sm:$0xff]  }
  0x16   : > { %795 = vmatprep.subr.bf16.mxu0 %v1335_v13  ;;  %v1341_v17 = vld [vmem:[%s1541_s22 + $0x124] ss:$8 sps:$4 sm:$0xff]   ;;  %v1343_v18 = vld [vmem:[%s1541_s22 + $0x120] ss:$8 sps:$4 sm:$0xff]   ;;  %v1322_v19 = vld [vmem:[%s1541_s22 + $0x50] ss:$8 sps:$4 sm:$0xff]  }
  0x17   : > { %683 = vmatpush1.bf16.msra.mxu1 %v1310_v5  ;;  %v1347_v20 = vld [vmem:[%s1541_s22 + $0x134] ss:$8 sps:$4 sm:$0xff]   ;;  %v1323_v21 = vld [vmem:[%s1541_s22 + $0x64] ss:$8 sps:$4 sm:$0xff]   ;;  %v1349_v22 = vld [vmem:[%s1541_s22 + $0x130] ss:$8 sps:$4 sm:$0xff]  }
  0x18   : > { %684 = vmatprep.subr.bf16.mxu1 %v1311_v6  ;;  %v1325_v23 = vld [vmem:[%s1541_s22 + $0x60] ss:$8 sps:$4 sm:$0xff]   ;;  %v1353_v24 = vld [vmem:[%s1541_s22 + $0x144] ss:$8 sps:$4 sm:$0xff]   ;;  %v1326_v25 = vld [vmem:[%s1541_s22 + $0x74] ss:$8 sps:$4 sm:$0xff]  }
  0x19   : > { %796 = vmatpush1.bf16.msra.mxu0 %v1337_v14  ;;  %v1355_v26 = vld [vmem:[%s1541_s22 + $0x140] ss:$8 sps:$4 sm:$0xff]   ;;  %v1328_v27 = vld [vmem:[%s1541_s22 + $0x70] ss:$8 sps:$4 sm:$0xff]   ;;  %v1359_v28 = vld [vmem:[%s1541_s22 + $0x154] ss:$8 sps:$4 sm:$0xff]  }
  0x1a   : > { %797 = vmatprep.subr.bf16.mxu0 %v1341_v17  ;;  %v1332_v29 = vld [vmem:[%s1541_s22 + $0x84] ss:$8 sps:$4 sm:$0xff]   ;;  %v1361_v30 = vld [vmem:[%s1541_s22 + $0x150] ss:$8 sps:$4 sm:$0xff]   ;;  %v1334_v31 = vld [vmem:[%s1541_s22 + $0x80] ss:$8 sps:$4 sm:$0xff]  }
  0x1b   : > { %685 = vmatpush1.bf16.msra.mxu1 %v1313_v7  ;;  %v1365_v32 = vld [vmem:[%s1541_s22 + $0x164] ss:$8 sps:$4 sm:$0xff]   ;;  %v1338_v33 = vld [vmem:[%s1541_s22 + $0x94] ss:$8 sps:$4 sm:$0xff]   ;;  %v1340_v34 = vld [vmem:[%s1541_s22 + $0x90] ss:$8 sps:$4 sm:$0xff]  }
  0x1c   : > { %686 = vmatprep.subr.bf16.mxu1 %v1314_v8  ;;  %v1367_v35 = vld [vmem:[%s1541_s22 + $0x160] ss:$8 sps:$4 sm:$0xff]   ;;  %v1371_v36 = vld [vmem:[%s1541_s22 + $0x174] ss:$8 sps:$4 sm:$0xff]   ;;  %v1344_v37 = vld [vmem:[%s1541_s22 + $0xa4] ss:$8 sps:$4 sm:$0xff]  }
  0x1d   : > { %798 = vmatpush1.bf16.msra.mxu0 %v1343_v18  ;;  %v1373_v38 = vld [vmem:[%s1541_s22 + $0x170] ss:$8 sps:$4 sm:$0xff]   ;;  %v1346_v39 = vld [vmem:[%s1541_s22 + $0xa0] ss:$8 sps:$4 sm:$0xff]   ;;  %v1350_v40 = vld [vmem:[%s1541_s22 + $0xb4] ss:$8 sps:$4 sm:$0xff]  }
  0x1e   : > { %799 = vmatprep.subr.bf16.mxu0 %v1347_v20  ;;  %v1352_v42 = vld [vmem:[%s1541_s22 + $0xb0] ss:$8 sps:$4 sm:$0xff]   ;;  %v1356_v43 = vld [vmem:[%s1541_s22 + $0xc4] ss:$8 sps:$4 sm:$0xff]   ;;  %v1358_v44 = vld [vmem:[%s1541_s22 + $0xc0] ss:$8 sps:$4 sm:$0xff]  }
  0x1f   : > { %687 = vmatpush1.bf16.msra.mxu1 %v1316_v9  ;;  %v1362_v45 = vld [vmem:[%s1541_s22 + $0xd4] ss:$8 sps:$4 sm:$0xff]   ;;  %v1364_v47 = vld [vmem:[%s1541_s22 + $0xd0] ss:$8 sps:$4 sm:$0xff]   ;;  %v1368_v48 = vld [vmem:[%s1541_s22 + $0xe4] ss:$8 sps:$4 sm:$0xff]  }
  0x20   : > { %688 = vmatprep.subr.bf16.mxu1 %v1317_v12  ;;  %v1370_v49 = vld [vmem:[%s1541_s22 + $0xe0] ss:$8 sps:$4 sm:$0xff]   ;;  %v1374_v50 = vld [vmem:[%s1541_s22 + $0xf4] ss:$8 sps:$4 sm:$0xff]   ;;  %v1376_v52 = vld [vmem:[%s1541_s22 + $0xf0] ss:$8 sps:$4 sm:$0xff]  }
  0x21   : > { %800 = vmatpush1.bf16.msra.mxu0 %v1349_v22  ;;  %v1396_v2 = vld [vmem:[%s1764_s1 + $0x60] ss:$12 sps:$4 sm:$0xff]   ;;  %v1398_v3 = vld [vmem:[%s1764_s1 + $0x7c] ss:$12 sps:$4 sm:$0xff]   ;;  %v1400_v5 = vld [vmem:[%s1764_s1 + $0x78] ss:$12 sps:$4 sm:$0xff]  }
  0x22   : > { %801 = vmatprep.subr.bf16.mxu0 %v1353_v24  ;;  %v1405_v4 = vld [vmem:[%s1764_s1 + $0xb0] ss:$12 sps:$4 sm:$0xff]   ;;  %v1402_v6 = vld [vmem:[%s1764_s1 + $0x94] ss:$12 sps:$4 sm:$0xff]   ;;  %v1406_v7 = vld [vmem:[%s1764_s1 + $0xac] ss:$12 sps:$4 sm:$0xff]  }
  0x23   : > { %689 = vmatpush1.bf16.msra.mxu1 %v1319_v15  ;;  %v1408_v8 = vld [vmem:[%s1764_s1 + $0xa8] ss:$12 sps:$4 sm:$0xff]  }
  0x24   : > { %690 = vmatprep.subr.bf16.mxu1 %v1320_v16 }
  0x25   : > { %802 = vmatpush1.bf16.msra.mxu0 %v1355_v26 }
  0x26   : > { %803 = vmatprep.subr.bf16.mxu0 %v1359_v28 }
  0x27   : > { %691 = vmatpush1.bf16.msra.mxu1 %v1322_v19 }
  0x28   : > { %692 = vmatprep.subr.bf16.mxu1 %v1323_v21 }
  0x29   : > { %804 = vmatpush1.bf16.msra.mxu0 %v1361_v30 }
  0x2a   : > { %805 = vmatprep.subr.bf16.mxu0 %v1365_v32 }
  0x2b   : > { %693 = vmatpush1.bf16.msra.mxu1 %v1325_v23 }
  0x2c   : > { %694 = vmatprep.subr.bf16.mxu1 %v1326_v25 }
  0x2d   : > { %806 = vmatpush1.bf16.msra.mxu0 %v1367_v35 }
  0x2e   : > { %807 = vmatprep.subr.bf16.mxu0 %v1371_v36 }
  0x2f   : > { %695 = vmatpush1.bf16.msra.mxu1 %v1328_v27 }
  0x30   : > { %696 = vmatprep.subr.bf16.mxu1 %v1332_v29 }
  0x31   : > { %808 = vmatpush1.bf16.msra.mxu0 %v1373_v38 }
  0x33   : > { %697 = vmatpush1.bf16.msra.mxu1 %v1334_v31 }
  0x34   : > { %698 = vmatprep.subr.bf16.mxu1 %v1338_v33  ;;  %826 = vmatmul.mubr.bf16.vlgmr.msra.gmra.mrb[0].mxu0 %v1377_v41 }
  0x35   : > { %835 = vmatprep.mubr.bf16.mxu0 %v1497_v0 }
  0x37   : > { %699 = vmatpush1.bf16.msra.mxu1 %v1340_v34 }
  0x38   : > { %700 = vmatprep.subr.bf16.mxu1 %v1344_v37 }
  0x3b   : > { %701 = vmatpush1.bf16.msra.mxu1 %v1346_v39 }
  0x3c   : > { %702 = vmatprep.subr.bf16.mxu1 %v1350_v40  ;;  %836 = vmatmul.mubr.bf16.gmra.mrb[4].mxu0 %v1381_v46 }
  0x3d   : > { %845 = vmatprep.mubr.bf16.mxu0 %v1497_v0 }
  0x3f   : > { %703 = vmatpush1.bf16.msra.mxu1 %v1352_v42 }
  0x40   : > { %704 = vmatprep.subr.bf16.mxu1 %v1356_v43 }
  0x43   : > { %705 = vmatpush1.bf16.msra.mxu1 %v1358_v44 }
  0x44   : > { %706 = vmatprep.subr.bf16.mxu1 %v1362_v45  ;;  %846 = vmatmul.mubr.bf16.gmra.mrb[8].mxu0 %v1385_v51 }
  0x45   : > { %855 = vmatprep.mubr.bf16.mxu0 %v1497_v0 }
  0x47   : > { %707 = vmatpush1.bf16.msra.mxu1 %v1364_v47 }
  0x48   : > { %708 = vmatprep.subr.bf16.mxu1 %v1368_v48 }
  0x4b   : > { %709 = vmatpush1.bf16.msra.mxu1 %v1370_v49 }
  0x4c   : > { %710 = vmatprep.subr.bf16.mxu1 %v1374_v50  ;;  %856 = vmatmul.mubr.bf16.gmra.mrb[12].mxu0 %v1389_v55 }
  0x4d   : > { %865 = vmatprep.mubr.bf16.mxu0 %v1497_v0 }
  0x4f   : > { %711 = vmatpush1.bf16.msra.mxu1 %v1376_v52 }
  0x52   : > { %713 = vmatmul.mubr.bf16.vlgmr.msra.gmra.mrb[0].mxu1 %v1378_v53 }
  0x53   : > { %722 = vmatprep.mubr.bf16.mxu1 %v1382_v54 }
  0x54   : > { %866 = vmatmul.mubr.bf16.gmra.mrb[16].mxu0 %v1393_v58 }
  0x55   : > { %875 = vmatprep.mubr.bf16.mxu0 %v1497_v0 }
  0x5a   : > { %723 = vmatmul.mubr.bf16.gmra.mrb[4].mxu1 %v1384_v56 }
  0x5b   : > { %732 = vmatprep.mubr.bf16.mxu1 %v1386_v57 }
  0x5c   : > { %876 = vmatmul.mubr.bf16.gmra.mrb[20].mxu0 %v1397_v61 }
  0x5d   : > { %885 = vmatprep.mubr.bf16.mxu0 %v1497_v0 }
  0x62   : > { %733 = vmatmul.mubr.bf16.gmra.mrb[8].mxu1 %v1388_v59 }
  0x63   : > { %742 = vmatprep.mubr.bf16.mxu1 %v1390_v60 }
  0x64   : > { %886 = vmatmul.mubr.bf16.gmra.mrb[24].mxu0 %v1401_v1 }
  0x65   : > { %895 = vmatprep.mubr.bf16.mxu0 %v1497_v0  ;;  %v1404_v0 = vld [vmem:[%s1764_s1 + $0x90] ss:$12 sps:$4 sm:$0xff]  }
  0x6a   : > { %743 = vmatmul.mubr.bf16.gmra.mrb[12].mxu1 %v1392_v62 }
  0x6b   : > { %752 = vmatprep.mubr.bf16.mxu1 %v1394_v63 }
  0x6c   : > { %896 = vmatmul.mubr.bf16.gmra.mrb[28].mxu0 %v1405_v4 }
  0x72   : > { %753 = vmatmul.mubr.bf16.gmra.mrb[16].mxu1 %v1396_v2 }
  0x73   : > { %762 = vmatprep.mubr.bf16.mxu1 %v1398_v3 }
  0x7a   : > { %763 = vmatmul.mubr.bf16.gmra.mrb[20].mxu1 %v1400_v5 }
  0x7b   : > { %772 = vmatprep.mubr.bf16.mxu1 %v1402_v6 }
  0x82   : > { %773 = vmatmul.mubr.bf16.gmra.mrb[24].mxu1 %v1404_v0 }
  0x83   : > { %782 = vmatprep.mubr.bf16.mxu1 %v1406_v7 }
  0x8a   : > { %783 = vmatmul.mubr.bf16.gmra.mrb[28].mxu1 %v1408_v8 }
 0x107   : > { %v827_v9 = vpop.f32.mrb[0].mxu0 }
 0x108   : > { %v829_v10 = vpop.f32.mrb[1].mxu0 }
 0x109   : > { %v831_v11 = vpop.f32.mrb[2].mxu0 }
 0x10a   : > { %v833_v12 = vpop.f32.mrb[3].mxu0 }
 0x10f   : > { %v837_v13 = vpop.f32.mrb[4].mxu0 }
 0x110   : > { %v839_v14 = vpop.f32.mrb[5].mxu0 }
 0x111   : > { %v841_v15 = vpop.f32.mrb[6].mxu0 }
 0x112   : > { %v843_v16 = vpop.f32.mrb[7].mxu0 }
 0x117   : > { %v847_v17 = vpop.f32.mrb[8].mxu0 }
 0x118   : > { %v849_v18 = vpop.f32.mrb[9].mxu0 }
 0x119   : > { %v851_v19 = vpop.f32.mrb[10].mxu0 }
 0x11a   : > { %v853_v20 = vpop.f32.mrb[11].mxu0 }
 0x11f   : > { %v857_v28 = vpop.f32.mrb[12].mxu0 }
 0x120   : > { %v859_v30 = vpop.f32.mrb[13].mxu0 }
 0x121   : > { %v861_v31 = vpop.f32.mrb[14].mxu0 }
 0x122   : > { %v863_v32 = vpop.f32.mrb[15].mxu0 }
 0x125   : > { %v714_v21 = vpop.f32.mrb[0].mxu1 }
 0x126   : > { %v828_v22 = vadd.f32 %v827_v9, %v714_v21  ;;  %v716_v23 = vpop.f32.mrb[1].mxu1 }
 0x127   : > { %v830_v24 = vadd.f32 %v829_v10, %v716_v23  ;;  %v718_v25 = vpop.f32.mrb[2].mxu1  ;;  %v867_v40 = vpop.f32.mrb[16].mxu0 }
 0x128   : > { %v832_v26 = vadd.f32 %v831_v11, %v718_v25  ;;  %v720_v27 = vpop.f32.mrb[3].mxu1  ;;  %v869_v42 = vpop.f32.mrb[17].mxu0  ;;  %v906_v5 = vmul.f32 0.5, %v828_v22 }
 0x129   : > { %v834_v29 = vadd.f32 %v833_v12, %v720_v27  ;;  %v871_v43 = vpop.f32.mrb[18].mxu0  ;;  %v907_v0 = vmul.f32 0.5, %v830_v24 }
 0x12a   : > { %v873_v44 = vpop.f32.mrb[19].mxu0  ;;  %v908_v7 = vmul.f32 0.5, %v832_v26  ;;  %1409 = vtanh.f32 %v906_v5 }
 0x12b   : > { %v909_v9 = vmul.f32 0.5, %v834_v29  ;;  %1411 = vtanh.f32 %v907_v0 }
 0x12c   : > { %1413 = vtanh.f32 %v908_v7 }
 0x12d   : > { %v724_v33 = vpop.f32.mrb[4].mxu1  ;;  %1415 = vtanh.f32 %v909_v9 }
 0x12e   : > { %v838_v34 = vadd.f32 %v837_v13, %v724_v33  ;;  %v726_v35 = vpop.f32.mrb[5].mxu1 }
 0x12f   : > { %v840_v36 = vadd.f32 %v839_v14, %v726_v35  ;;  %v728_v37 = vpop.f32.mrb[6].mxu1  ;;  %v877_v52 = vpop.f32.mrb[20].mxu0 }
 0x130   : > { %v842_v38 = vadd.f32 %v841_v15, %v728_v37  ;;  %v730_v39 = vpop.f32.mrb[7].mxu1  ;;  %v879_v54 = vpop.f32.mrb[21].mxu0  ;;  %v910_v12 = vmul.f32 0.5, %v838_v34 }
 0x131   : > { %v844_v41 = vadd.f32 %v843_v16, %v730_v39  ;;  %v881_v55 = vpop.f32.mrb[22].mxu0  ;;  %v911_v26 = vmul.f32 0.5, %v840_v36 }
 0x132   : > { %v883_v56 = vpop.f32.mrb[23].mxu0  ;;  %1417 = vtanh.f32 %v910_v12  ;;  %v912_v27 = vmul.f32 0.5, %v842_v38 }
 0x133   : > { %v913_v29 = vmul.f32 0.5, %v844_v41 }
 0x135   : > { %v734_v45 = vpop.f32.mrb[8].mxu1 }
 0x136   : > { %v848_v46 = vadd.f32 %v847_v17, %v734_v45  ;;  %v736_v47 = vpop.f32.mrb[9].mxu1 }
 0x137   : > { %v850_v48 = vadd.f32 %v849_v18, %v736_v47  ;;  %v738_v49 = vpop.f32.mrb[10].mxu1  ;;  %v1667_v1 = vpop.f32.mrb[24].mxu0 }
 0x138   : > { %v852_v50 = vadd.f32 %v851_v19, %v738_v49  ;;  %v740_v51 = vpop.f32.mrb[11].mxu1  ;;  %v1669_v3 = vpop.f32.mrb[25].mxu0  ;;  %v938_v15 = vmul.f32 0.5, %v848_v46 }
 0x139   : > { %v854_v53 = vadd.f32 %v853_v20, %v740_v51  ;;  %v1671_v4 = vpop.f32.mrb[26].mxu0  ;;  %v939_v19 = vmul.f32 0.5, %v850_v48 }
 0x13a   : > { %v1673_v6 = vpop.f32.mrb[27].mxu0  ;;  %v940_v22 = vmul.f32 0.5, %v852_v50  ;;  %1419 = vtanh.f32 %v938_v15 }
 0x13b   : > { %v941_v24 = vmul.f32 0.5, %v854_v53  ;;  %1421 = vtanh.f32 %v939_v19 }
 0x13c   : > { %1423 = vtanh.f32 %v940_v22 }
 0x13d   : > { %v744_v57 = vpop.f32.mrb[12].mxu1  ;;  %1425 = vtanh.f32 %v941_v24 }
 0x13e   : > { %v858_v58 = vadd.f32 %v857_v28, %v744_v57  ;;  %v746_v59 = vpop.f32.mrb[13].mxu1  ;;  %1427 = vtanh.f32 %v911_v26 }
 0x13f   : > { %v860_v60 = vadd.f32 %v859_v30, %v746_v59  ;;  %v748_v61 = vpop.f32.mrb[14].mxu1  ;;  %v1677_v18 = vpop.f32.mrb[28].mxu0  ;;  %1429 = vtanh.f32 %v912_v27  ;;  %v1010_v27 = vld [vmem:[%s1710_s23] sm:$0xff] }
 0x140   : > { %v862_v62 = vadd.f32 %v861_v31, %v748_v61  ;;  %v750_v63 = vpop.f32.mrb[15].mxu1  ;;  %v1681_v21 = vpop.f32.mrb[29].mxu0  ;;  %1431 = vtanh.f32 %v913_v29 }
 0x141   : > { %v864_v2 = vadd.f32 %v863_v32, %v750_v63  ;;  %v1683_v23 = vpop.f32.mrb[30].mxu0  ;;  %v942_v32 = vmul.f32 0.5, %v858_v58  ;;  %v943_v35 = vmul.f32 0.5, %v860_v60 }
 0x142   : > { %v1685_v25 = vpop.f32.mrb[31].mxu0  ;;  %v944_v36 = vmul.f32 0.5, %v862_v62 }
 0x143   : > { %v945_v41 = vmul.f32 0.5, %v864_v2  ;;  %1433 = vtanh.f32 %v942_v32 }
 0x144   : > { %1435 = vtanh.f32 %v943_v35 }
 0x145   : > { %v754_v8 = vpop.f32.mrb[16].mxu1  ;;  %1437 = vtanh.f32 %v944_v36 }
 0x146   : > { %v868_v10 = vadd.f32 %v867_v40, %v754_v8  ;;  %v756_v11 = vpop.f32.mrb[17].mxu1  ;;  %v1410_v40 = vpop.eup %1409  ;;  %1439 = vtanh.f32 %v945_v41  ;;  %v1013_v41 = vld [vmem:[%s1710_s23 + $0x18] sm:$0xff] }
 0x147   : > { %v870_v13 = vadd.f32 %v869_v42, %v756_v11  ;;  %v758_v14 = vpop.f32.mrb[18].mxu1  ;;  %v1412_v42 = vpop.eup %1411 }
 0x148   : > { %v1675_v16 = vadd.f32 %v871_v43, %v758_v14  ;;  %v760_v17 = vpop.f32.mrb[19].mxu1  ;;  %v1414_v43 = vpop.eup %1413  ;;  %v923_v53 = vadd.f32 1.0, %v1412_v42 }
 0x149   : > { %v1679_v20 = vadd.f32 %v873_v44, %v760_v17  ;;  %v970_v44 = vmul.f32 0.5, %v868_v10  ;;  %v1416_v45 = vpop.eup %1415  ;;  %v924_v57 = vadd.f32 1.0, %v1414_v43  ;;  %v971_v58 = vmul.f32 0.5, %v870_v13 }
 0x14a   : > { %v1418_v46 = vpop.eup %1417  ;;  %v925_v62 = vadd.f32 1.0, %v1416_v45  ;;  %v972_v63 = vmul.f32 0.5, %v1675_v16  ;;  %v931_v12 = vmul.f32 0.5, %v923_v53 }
 0x14b   : > { %v1420_v48 = vpop.eup %1419  ;;  %1441 = vtanh.f32 %v970_v44  ;;  %v973_v0 = vmul.f32 0.5, %v1679_v20  ;;  %v932_v13 = vmul.f32 0.5, %v924_v57  ;;  %v926_v26 = vadd.f32 1.0, %v1418_v46 }
 0x14c   : > { %v1422_v51 = vpop.eup %1421  ;;  %v933_v14 = vmul.f32 0.5, %v925_v62 }
 0x14d   : > { %v764_v28 = vpop.f32.mrb[20].mxu1  ;;  %v955_v5 = vadd.f32 1.0, %v1422_v51 }
 0x14e   : > { %v878_v30 = vadd.f32 %v877_v52, %v764_v28  ;;  %v766_v31 = vpop.f32.mrb[21].mxu1  ;;  %v922_v52 = vadd.f32 1.0, %v1410_v40  ;;  %v1011_v28 = vld [vmem:[%s1710_s23 + $0x8] sm:$0xff] }
 0x14f   : > { %v1687_v33 = vadd.f32 %v879_v54, %v766_v31  ;;  %v768_v34 = vpop.f32.mrb[22].mxu1  ;;  %v963_v19 = vmul.f32 0.5, %v955_v5 }
 0x150   : > { %v1689_v37 = vadd.f32 %v881_v55, %v768_v34  ;;  %v770_v39 = vpop.f32.mrb[23].mxu1  ;;  %v974_v8 = vmul.f32 0.5, %v878_v30  ;;  %v930_v10 = vmul.f32 0.5, %v922_v52  ;;  %v1012_v34 = vld [vmem:[%s1710_s23 + $0x10] sm:$0xff] }
 0x151   : > { %v1691_v38 = vadd.f32 %v883_v56, %v770_v39  ;;  %v1424_v56 = vpop.eup %1423  ;;  %v975_v39 = vmul.f32 0.5, %v1687_v33  ;;  %v1019_v46 = vmul.f32 %v1011_v28, %v963_v19 }
 0x152   : > { %v1426_v61 = vpop.eup %1425  ;;  %v976_v43 = vmul.f32 0.5, %v1689_v37 }
 0x153   : > { %v1428_v2 = vpop.eup %1427 }
 0x154   : > { %v1702_v7 = vpop.eup %1429  ;;  %v927_v42 = vadd.f32 1.0, %v1428_v2  ;;  %v1014_v2 = vld [vmem:[%s1710_s23 + $0x20] sm:$0xff] }
 0x155   : > { %v774_v47 = vpop.f32.mrb[24].mxu1  ;;  %v1704_v9 = vpop.eup %1431 }
 0x156   : > { %v888_v49 = vadd.f32 %v1667_v1, %v774_v47  ;;  %v776_v50 = vpop.f32.mrb[25].mxu1  ;;  %v1434_v11 = vpop.eup %1433  ;;  %v977_v47 = vmul.f32 0.5, %v1691_v38 }
 0x157   : > { %v890_v54 = vadd.f32 %v1669_v3, %v776_v50  ;;  %v778_v55 = vpop.f32.mrb[26].mxu1  ;;  %v954_v3 = vadd.f32 1.0, %v1420_v48  ;;  %v1436_v16 = vpop.eup %1435 }
 0x158   : > { %1443 = vtanh.f32 %v888_v49  ;;  %v892_v59 = vadd.f32 %v1671_v4, %v778_v55  ;;  %v780_v60 = vpop.f32.mrb[27].mxu1  ;;  %v956_v4 = vadd.f32 1.0, %v1424_v56  ;;  %v1438_v24 = vpop.eup %1437  ;;  %v959_v51 = vadd.f32 1.0, %v1436_v16 }
 0x159   : > { %1445 = vtanh.f32 %v890_v54  ;;  %v894_v1 = vadd.f32 %v1673_v6, %v780_v60  ;;  %v957_v6 = vadd.f32 1.0, %v1426_v61  ;;  %v962_v17 = vmul.f32 0.5, %v954_v3  ;;  %v1440_v32 = vpop.eup %1439 }
 0x15a   : > { %1447 = vtanh.f32 %v892_v59  ;;  %v964_v29 = vmul.f32 0.5, %v956_v4  ;;  %v1719_v36 = vpop.eup %1441  ;;  %v960_v53 = vadd.f32 1.0, %v1438_v24  ;;  %v961_v56 = vadd.f32 1.0, %v1440_v32 }
 0x15b   : > { %1449 = vtanh.f32 %v894_v1  ;;  %v965_v35 = vmul.f32 0.5, %v957_v6  ;;  %v1018_v45 = vmul.f32 %v1010_v27, %v962_v17  ;;  %v928_v60 = vadd.f32 1.0, %v1702_v7 }
 0x15c   : > { %1451 = vtanh.f32 %v971_v58  ;;  %v1020_v48 = vmul.f32 %v1012_v34, %v964_v29  ;;  %v929_v1 = vadd.f32 1.0, %v1704_v9  ;;  %v967_v3 = vmul.f32 0.5, %v959_v51 }
 0x15d   : > { %1453 = vtanh.f32 %v972_v63  ;;  %v784_v15 = vpop.f32.mrb[28].mxu1  ;;  %v1021_v37 = vmul.f32 %v1013_v41, %v965_v35  ;;  %v934_v4 = vmul.f32 0.5, %v926_v26  ;;  %v968_v7 = vmul.f32 0.5, %v960_v53 }
 0x15e   : > { %1455 = vtanh.f32 %v973_v0  ;;  %v898_v20 = vadd.f32 %v1677_v18, %v784_v15  ;;  %v786_v22 = vpop.f32.mrb[29].mxu1  ;;  %v935_v6 = vmul.f32 0.5, %v927_v42  ;;  %v1017_v15 = vld [vmem:[%s1710_s23 + $0x38] sm:$0xff]  ;;  %v937_v19 = vmul.f32 0.5, %v929_v1 }
 0x15f   : > { %1457 = vtanh.f32 %v974_v8  ;;  %v900_v30 = vadd.f32 %v1681_v21, %v786_v22  ;;  %v788_v31 = vpop.f32.mrb[30].mxu1  ;;  %v1015_v8 = vld [vmem:[%s1710_s23 + $0x28] sm:$0xff]  ;;  %v986_v22 = vadd.f32 1.0, %v1719_v36 }
 0x160   : > { %1459 = vtanh.f32 %v898_v20  ;;  %v902_v40 = vadd.f32 %v1683_v23, %v788_v31  ;;  %v790_v18 = vpop.f32.mrb[31].mxu1  ;;  %v958_v23 = vadd.f32 1.0, %v1434_v11  ;;  %v1016_v11 = vld [vmem:[%s1710_s23 + $0x30] sm:$0xff]  ;;  %v1023_v20 = vmul.f32 %v1015_v8, %v967_v3 }
 0x161   : > { %1461 = vtanh.f32 %v900_v30  ;;  %v904_v21 = vadd.f32 %v1685_v25, %v790_v18  ;;  %v1024_v27 = vmul.f32 %v1016_v11, %v968_v7  ;;  %v994_v41 = vmul.f32 0.5, %v986_v22 }
 0x162   : > { %v1444_v44 = vpop.eup %1443  ;;  %1463 = vtanh.f32 %v902_v40  ;;  %v966_v61 = vmul.f32 0.5, %v958_v23 }
 0x163   : > { %v1446_v33 = vpop.eup %1445  ;;  %v1026_v49 = vmul.f32 %v1444_v44, %v930_v10  ;;  %1465 = vtanh.f32 %v904_v21 }
 0x164   : > { %v1448_v50 = vpop.eup %1447  ;;  %1467 = vtanh.f32 %v975_v39  ;;  %v1027_v25 = vmul.f32 %v1446_v33, %v931_v12  ;;  %v969_v12 = vmul.f32 0.5, %v961_v56 }
 0x165   : > { %v1450_v52 = vpop.eup %1449  ;;  %1469 = vtanh.f32 %v976_v43  ;;  %v1034_v38 = vadd.f32 %v1026_v49, %v1018_v45  ;;  %v1028_v54 = vmul.f32 %v1448_v50, %v932_v13  ;;  %v936_v13 = vmul.f32 0.5, %v928_v60 }
 0x166   : > { %v1452_v55 = vpop.eup %1451  ;;  %1471 = vtanh.f32 %v977_v47  ;;  %v1035_v57 = vadd.f32 %v1027_v25, %v1019_v46  ;;  %v1029_v58 = vmul.f32 %v1450_v52, %v933_v14  ;;  %v1022_v14 = vmul.f32 %v1014_v2, %v966_v61 }
 0x167   : > { %v1454_v59 = vpop.eup %1453  ;;  %1473 = vtanh.f32 %v1034_v38  ;;  %1066 = vst [vmem:[%s1729_s26] sm:$0xff] %v1034_v38  ;;  %v1036_v62 = vadd.f32 %v1028_v54, %v1020_v48  ;;  %v987_v28 = vadd.f32 1.0, %v1452_v55  ;;  %v1025_v32 = vmul.f32 %v1017_v15, %v969_v12 }
 0x168   : > { %v1456_v63 = vpop.eup %1455  ;;  %1475 = vtanh.f32 %v1035_v57  ;;  %1067 = vst [vmem:[%s1729_s26 + $0x8] sm:$0xff] %v1035_v57  ;;  %v1037_v5 = vadd.f32 %v1029_v58, %v1021_v37  ;;  %v988_v34 = vadd.f32 1.0, %v1454_v59 }
 0x169   : > { %v1458_v0 = vpop.eup %1457  ;;  %1477 = vtanh.f32 %v1036_v62  ;;  %1068 = vst [vmem:[%s1729_s26 + $0x10] sm:$0xff] %v1036_v62  ;;  %v989_v18 = vadd.f32 1.0, %v1456_v63  ;;  %v995_v44 = vmul.f32 0.5, %v987_v28 }
 0x16a   : > { %v1460_v10 = vpop.eup %1459  ;;  %1479 = vtanh.f32 %v1037_v5  ;;  %1069 = vst [vmem:[%s1729_s26 + $0x18] sm:$0xff] %v1037_v5  ;;  %v996_v46 = vmul.f32 0.5, %v988_v34  ;;  %v990_v50 = vadd.f32 1.0, %v1458_v0 }
 0x16b   : > { %v1462_v9 = vpop.eup %1461  ;;  %v1030_v16 = vmul.f32 %v1460_v10, %v934_v4  ;;  %v997_v48 = vmul.f32 0.5, %v989_v18 }
 0x16c   : > { %v1464_v17 = vpop.eup %1463  ;;  %v1031_v24 = vmul.f32 %v1462_v9, %v935_v6  ;;  %v998_v38 = vmul.f32 0.5, %v990_v50 }
 0x16d   : > { %v1466_v26 = vpop.eup %1465  ;;  %v1038_v29 = vadd.f32 %v1030_v16, %v1022_v14  ;;  %v1032_v30 = vmul.f32 %v1464_v17, %v936_v13 }
 0x16e   : > { %v1468_v31 = vpop.eup %1467  ;;  %v1039_v35 = vadd.f32 %v1031_v24, %v1023_v20  ;;  %v1033_v39 = vmul.f32 %v1466_v26, %v937_v19 }
 0x16f   : > { %v1470_v40 = vpop.eup %1469  ;;  %1481 = vtanh.f32 %v1038_v29  ;;  %1070 = vst [vmem:[%s1729_s26 + $0x20] sm:$0xff] %v1038_v29  ;;  %v1040_v36 = vadd.f32 %v1032_v30, %v1024_v27  ;;  %v991_v51 = vadd.f32 1.0, %v1468_v31 }
 0x170   : > { %v1472_v42 = vpop.eup %1471  ;;  %1483 = vtanh.f32 %v1039_v35  ;;  %1071 = vst [vmem:[%s1729_s26 + $0x28] sm:$0xff] %v1039_v35  ;;  %v1041_v43 = vadd.f32 %v1033_v39, %v1025_v32  ;;  %v992_v52 = vadd.f32 1.0, %v1470_v40 }
 0x171   : > { %v1474_v21 = vpop.eup %1473  ;;  %1485 = vtanh.f32 %v1040_v36  ;;  %1072 = vst [vmem:[%s1729_s26 + $0x30] sm:$0xff] %v1040_v36  ;;  %v993_v53 = vadd.f32 1.0, %v1472_v42  ;;  %v999_v55 = vmul.f32 0.5, %v991_v51 }
 0x172   : > { %v1476_v45 = vpop.eup %1475  ;;  %v1050_v47 = vmul.f32 %v1474_v21, %v994_v41  ;;  %1487 = vtanh.f32 %v1041_v43  ;;  %1073 = vst [vmem:[%s1729_s26 + $0x38] sm:$0xff] %v1041_v43  ;;  %v1000_v57 = vmul.f32 0.5, %v992_v52 }
 0x173   : > { %v1478_v33 = vpop.eup %1477  ;;  %v1051_v23 = vmul.f32 %v1476_v45, %v995_v44  ;;  %v1001_v60 = vmul.f32 0.5, %v993_v53 }
 0x174   : > { %v1480_v49 = vpop.eup %1479  ;;  %1058 = vst [vmem:[%s1748_s29] sm:$0xff] %v1050_v47  ;;  %v1052_v37 = vmul.f32 %v1478_v33, %v996_v46 }
 0x175   : > { %1059 = vst [vmem:[%s1748_s29 + $0x8] sm:$0xff] %v1051_v23  ;;  %v1053_v25 = vmul.f32 %v1480_v49, %v997_v48 }
 0x176   : > { %1060 = vst [vmem:[%s1748_s29 + $0x10] sm:$0xff] %v1052_v37 }
 0x177   : > { %1061 = vst [vmem:[%s1748_s29 + $0x18] sm:$0xff] %v1053_v25 }
 0x179   : > { %v1482_v54 = vpop.eup %1481 }
 0x17a   : > { %v1484_v56 = vpop.eup %1483  ;;  %v1054_v58 = vmul.f32 %v1482_v54, %v998_v38 }
 0x17b   : > { %v1486_v59 = vpop.eup %1485  ;;  %v1055_v61 = vmul.f32 %v1484_v56, %v999_v55 }
 0x17c   : > { %v1488_v62 = vpop.eup %1487  ;;  %1062 = vst [vmem:[%s1748_s29 + $0x20] sm:$0xff] %v1054_v58  ;;  %v1056_v63 = vmul.f32 %v1486_v59, %v1000_v57 }
 0x17d   : > { %1063 = vst [vmem:[%s1748_s29 + $0x28] sm:$0xff] %v1055_v61  ;;  %v1057_v1 = vmul.f32 %v1488_v62, %v1001_v60 }
 0x17e   : > { %1064 = vst [vmem:[%s1748_s29 + $0x30] sm:$0xff] %v1056_v63 }
 0x17f   : > { %1065 = vst [vmem:[%s1748_s29 + $0x38] sm:$0xff] %v1057_v1 }
 0x180 PF: > { %s15_s15 = sadd.s32 1, %s1495_s15  }
 0x181   : > { %p12_p4 = scmp.ge.s32.totalorder %s15_s15, 4  }
 0x183   :  { %14 = sbr.rel (!%p12_p4) target bundleno = 1 (0x1), region = 77 }

</bundles_post_ra>
